<compile_context>
chip_gen: v5e
topology: v5e:2x2
jax: 0.10.0
libtpu: 0.0.40
codegen_flags: <defaults>
</compile_context>

<pallas_src>
import functools

import jax
import jax.numpy as jnp
from jax.experimental import pallas as pl
from jax.experimental.pallas import tpu as pltpu


def _selective_partial_kernel(pred_ref, sel_ref, tgt_ref, out_ref, *, batch_size):
    """One batch tile -> per-tile partial sums written to out_ref (1, 8, 128)."""
    step = pl.program_id(0)

    logits = pred_ref[...].astype(jnp.float32)      # (TB, C) cast in-kernel
    sel = sel_ref[...].astype(jnp.float32)          # (TB, 1)
    tgt = tgt_ref[...]                              # (TB, 1) int32

    TB, C = logits.shape

    # ---- validity mask for the ragged last tile (no wrapper-side padding) ----
    row = jax.lax.broadcasted_iota(jnp.int32, (TB, 1), 0)
    valid = (step * TB + row) < batch_size          # (TB, 1) bool

    # ---- per-row cross entropy (reduction='none') -----------------------------
    # ce_i = logsumexp(logits_i) - logits_i[target_i]
    class_ids = jax.lax.broadcasted_iota(jnp.int32, (TB, C), 1)
    onehot = class_ids == tgt                                   # (TB, C)
    tgt_logit = jnp.sum(jnp.where(onehot, logits, 0.0),
                        axis=-1, keepdims=True)                 # (TB, 1)

    m = jnp.max(logits, axis=-1, keepdims=True)                 # (TB, 1)
    # exactly one exp per logit element (single EUP pass)
    lse = jnp.log(jnp.sum(jnp.exp(logits - m),
                          axis=-1, keepdims=True)) + m          # (TB, 1)
    ce = lse - tgt_logit                                        # (TB, 1)

    # ---- masked per-tile partial sums ----------------------------------------
    # Mask the PRODUCT (not just sel): OOB rows may carry NaN/inf logits and
    # 0 * nan = nan would poison the sum.  jnp.where does not leak the
    # unselected branch.
    sum_sel = jnp.sum(jnp.where(valid, sel, 0.0))
    sum_ce_sel = jnp.sum(jnp.where(valid, ce * sel, 0.0))

    # ---- write partials to lanes 0/1 of sublane 0 of this tile's block -------
    lane = jax.lax.broadcasted_iota(jnp.int32, (1, 8, 128), 2)
    sub = jax.lax.broadcasted_iota(jnp.int32, (1, 8, 128), 1)
    out_ref[...] = jnp.where((sub == 0) & (lane == 0), sum_sel,
                             jnp.where((sub == 0) & (lane == 1), sum_ce_sel,
                                       jnp.float32(0.0)))


def selective_loss(prediction_out, selection_out, target, *,
                   coverage: float, lm: float = 32.0, threshold: float = 0.5,
                   batch_tile: int | None = None):
    """Mirrors SelectiveLoss.forward; `threshold` is unused (as in the reference).

    Note: like the PyTorch reference, empirical_risk divides by the empirical
    coverage with no guard -- all-zero selection outputs produce inf/NaN.
    """
    assert 0.0 < coverage <= 1.0
    assert 0.0 < lm

    B, C = prediction_out.shape
    pred = prediction_out                           # keep NATIVE dtype (bf16 ok)
    sel = selection_out.reshape(B, 1).astype(jnp.float32)
    tgt = target.reshape(B, 1).astype(jnp.int32)

    itemsize = jnp.dtype(pred.dtype).itemsize
    # sublane packing of the logits block's row dim: f32->8, bf16->16, int8->32
    row_mult = 8 if itemsize >= 4 else (16 if itemsize == 2 else 32)

    # ---- VMEM-capacity-aware byte budget for the batch tile -------------------
    try:
        vmem_cap = int(pltpu.get_tpu_info().vmem_capacity_bytes)
    except Exception:
        vmem_cap = 64 * 1024 * 1024                 # v7x-safe fallback
    budget = min(40 * 1024 * 1024, vmem_cap // 2)

    # per-row VMEM cost: 2x-buffered logits + ~4 f32 (TB,C) temporaries
    #                    + 2x-buffered lane-padded (TB,1) sel / tgt blocks
    per_row = 2 * C * itemsize + 4 * C * 4 + 2 * 2 * 128 * 4

    if batch_tile is None:
        tb = budget // per_row
    else:
        tb = int(batch_tile)
    tb = max(row_mult, (tb // row_mult) * row_mult)
    b_up = ((B + row_mult - 1) // row_mult) * row_mult
    tb = min(tb, b_up)                              # don't tile past the batch

    nb = -(-B // tb)                                # ceil(B / tb); NO padding copy

    footprint = tb * per_row + (2 << 20)
    vmem_limit = int(min(vmem_cap * 3 // 4, max(16 << 20, footprint + (4 << 20))))

    kernel = functools.partial(_selective_partial_kernel, batch_size=int(B))

    partials = pl.pallas_call(
        kernel,
        out_shape=jax.ShapeDtypeStruct((nb, 8, 128), jnp.float32),
        grid_spec=pltpu.PrefetchScalarGridSpec(
            num_scalar_prefetch=0,
            grid=(nb,),
            in_specs=[
                pl.BlockSpec((tb, C), lambda i: (i, 0)),   # logits tile
                pl.BlockSpec((tb, 1), lambda i: (i, 0)),   # selection tile
                pl.BlockSpec((tb, 1), lambda i: (i, 0)),   # target tile
            ],
            out_specs=pl.BlockSpec((1, 8, 128), lambda i: (i, 0, 0)),
        ),
        compiler_params=pltpu.CompilerParams(
            dimension_semantics=("parallel",),      # lets v7x shard batch tiles
            vmem_limit_bytes=vmem_limit,
        ),
    )(pred, sel, tgt)

    # ---- finalize from the global sums (tiny wrapper-side reduction) ----------
    sum_sel = jnp.sum(partials[:, 0, 0])
    sum_ce_sel = jnp.sum(partials[:, 0, 1])
    inv_b = jnp.float32(1.0 / B)
    cov = sum_sel * inv_b                           # mean(sel)
    risk = (sum_ce_sel * inv_b) / cov               # mean(ce*sel) / cov
    pen = jnp.float32(lm) * jnp.maximum(jnp.float32(coverage) - cov,
                                        jnp.float32(0.0)) ** 2
    selective = risk + pen
    loss_dict = {
        "emprical_coverage": cov,   # (sic) key spelling matches the reference
        "emprical_risk": risk,
        "penalty": pen,
    }
    return selective, loss_dict


def _reference(prediction_out, selection_out, target, coverage, lm):
    # Pure-JAX reference of the PyTorch forward, for verification.
    logits = prediction_out.astype(jnp.float32)
    sel = selection_out.reshape(-1).astype(jnp.float32)
    logp = jax.nn.log_softmax(logits, axis=-1)
    ce = -jnp.take_along_axis(logp, target.reshape(-1, 1), axis=-1).reshape(-1)
    cov = jnp.mean(sel)
    risk = jnp.mean(ce * sel) / cov
    pen = lm * jnp.maximum(coverage - cov, 0.0) ** 2
    return risk + pen, cov, risk, pen


if __name__ == "__main__":
    key = jax.random.PRNGKey(0)
    coverage_target = 0.8
    lm = 32.0

    # ---- test 1: small f32 problem, single grid step -------------------------
    B, C = 8, 32
    k1, k2, k3 = jax.random.split(key, 3)
    prediction_out = jax.random.normal(k1, (B, C), dtype=jnp.float32)
    selection_out = jax.nn.sigmoid(jax.random.normal(k2, (B, 1), dtype=jnp.float32))
    target = jax.random.randint(k3, (B,), 0, C, dtype=jnp.int32)

    loss, loss_dict = selective_loss(prediction_out, selection_out, target,
                                     coverage=coverage_target, lm=lm)
    loss = jax.block_until_ready(loss)

    ref_loss, ref_cov, ref_risk, ref_pen = _reference(
        prediction_out, selection_out, target, coverage_target, lm)
    assert jnp.allclose(loss, ref_loss, rtol=1e-5, atol=1e-5)
    assert jnp.allclose(loss_dict["emprical_coverage"], ref_cov, rtol=1e-5, atol=1e-5)
    assert jnp.allclose(loss_dict["emprical_risk"], ref_risk, rtol=1e-5, atol=1e-5)
    assert jnp.allclose(loss_dict["penalty"], ref_pen, rtol=1e-5, atol=1e-5)

    # ---- test 2: bf16 logits, ragged batch, multi-step grid (masked last tile)
    B2, C2 = 70, 256
    k4, k5, k6 = jax.random.split(jax.random.PRNGKey(0), 3)
    pred2 = jax.random.normal(k4, (B2, C2), dtype=jnp.float32).astype(jnp.bfloat16)
    sel2 = jax.nn.sigmoid(jax.random.normal(k5, (B2, 1), dtype=jnp.float32))
    tgt2 = jax.random.randint(k6, (B2,), 0, C2, dtype=jnp.int32)

    loss2, ld2 = selective_loss(pred2, sel2, tgt2,
                                coverage=coverage_target, lm=lm, batch_tile=16)
    loss2 = jax.block_until_ready(loss2)

    r_loss2, r_cov2, r_risk2, r_pen2 = _reference(pred2, sel2, tgt2,
                                                  coverage_target, lm)
    assert jnp.allclose(loss2, r_loss2, rtol=1e-4, atol=1e-5)
    assert jnp.allclose(ld2["emprical_coverage"], r_cov2, rtol=1e-4, atol=1e-5)
    assert jnp.allclose(ld2["emprical_risk"], r_risk2, rtol=1e-4, atol=1e-5)
    assert jnp.allclose(ld2["penalty"], r_pen2, rtol=1e-4, atol=1e-5)

    # ---- test 3: f32, ragged batch handled inside a single auto-sized tile ---
    B3, C3 = 50, 96
    k7, k8, k9 = jax.random.split(jax.random.PRNGKey(1), 3)
    pred3 = jax.random.normal(k7, (B3, C3), dtype=jnp.float32)
    sel3 = jax.nn.sigmoid(jax.random.normal(k8, (B3, 1), dtype=jnp.float32))
    tgt3 = jax.random.randint(k9, (B3,), 0, C3, dtype=jnp.int32)

    loss3, ld3 = selective_loss(pred3, sel3, tgt3,
                                coverage=coverage_target, lm=lm)
    loss3 = jax.block_until_ready(loss3)

    r_loss3, r_cov3, r_risk3, r_pen3 = _reference(pred3, sel3, tgt3,
                                                  coverage_target, lm)
    assert jnp.allclose(loss3, r_loss3, rtol=1e-5, atol=1e-5)
    assert jnp.allclose(ld3["emprical_coverage"], r_cov3, rtol=1e-5, atol=1e-5)
    assert jnp.allclose(ld3["emprical_risk"], r_risk3, rtol=1e-5, atol=1e-5)
    assert jnp.allclose(ld3["penalty"], r_pen3, rtol=1e-5, atol=1e-5)

    print("KERNEL_OK")
</pallas_src>

<mosaic_0001>
module attributes {stable_mosaic.version = 11 : i64} {
  func.func @_selective_partial_kernel(%arg0: i32, %arg1: memref<8x32xf32, #tpu.memory_space<vmem>>, %arg2: memref<8x1xf32, #tpu.memory_space<vmem>>, %arg3: memref<8x1xi32, #tpu.memory_space<vmem>>, %arg4: memref<1x8x128xf32, #tpu.memory_space<vmem>>) attributes {dimension_semantics = [#tpu.dimension_semantics<parallel>], iteration_bounds = array<i64: 1>, scalar_prefetch = 0 : i64, scratch_operands = 0 : i64, tpu.core_type = #tpu.core_type<tc>, window_params = [{transform_indices = @transform_0, window_bounds = array<i64: 8, 32>}, {transform_indices = @transform_1, window_bounds = array<i64: 8, 1>}, {transform_indices = @transform_2, window_bounds = array<i64: 8, 1>}, {transform_indices = @transform_3, window_bounds = array<i64: 1, 8, 128>}]} {
    %c0 = arith.constant 0 : index
    %c0_0 = arith.constant 0 : index
    %0 = vector.load %arg1[%c0, %c0_0] : memref<8x32xf32, #tpu.memory_space<vmem>>, vector<8x32xf32>
    %c0_1 = arith.constant 0 : index
    %c0_2 = arith.constant 0 : index
    %1 = vector.load %arg2[%c0_1, %c0_2] : memref<8x1xf32, #tpu.memory_space<vmem>>, vector<8x1xf32>
    %c0_3 = arith.constant 0 : index
    %c0_4 = arith.constant 0 : index
    %2 = vector.load %arg3[%c0_3, %c0_4] : memref<8x1xi32, #tpu.memory_space<vmem>>, vector<8x1xi32>
    %3 = tpu.iota {dimensions = array<i32: 0>} : vector<8x1xi32>
    %c8_i32 = arith.constant 8 : i32
    %4 = arith.muli %arg0, %c8_i32 : i32
    %5 = vector.broadcast %4 : i32 to vector<8x1xi32>
    %6 = arith.addi %5, %3 : vector<8x1xi32>
    %c8_i32_5 = arith.constant 8 : i32
    %7 = vector.broadcast %c8_i32_5 : i32 to vector<8x1xi32>
    %8 = arith.cmpi slt, %6, %7 : vector<8x1xi32>
    %9 = tpu.iota {dimensions = array<i32: 1>} : vector<8x32xi32>
    %10 = vector.broadcast %2 : vector<8x1xi32> to vector<8x32xi32>
    %11 = arith.cmpi eq, %9, %10 : vector<8x32xi32>
    %cst = arith.constant 0.000000e+00 : f32
    %12 = vector.broadcast %cst : f32 to vector<8x32xf32>
    %13 = arith.select %11, %0, %12 : vector<8x32xi1>, vector<8x32xf32>
    %cst_6 = arith.constant dense<0.000000e+00> : vector<8xf32>
    %14 = vector.multi_reduction <add>, %13, %cst_6 [1] : vector<8x32xf32> to vector<8xf32>
    %15 = vector.shape_cast %14 : vector<8xf32> to vector<8x1xf32>
    %cst_7 = arith.constant dense<0xFF800000> : vector<8xf32>
    %16 = vector.multi_reduction <maximumf>, %0, %cst_7 [1] : vector<8x32xf32> to vector<8xf32>
    %17 = vector.shape_cast %16 : vector<8xf32> to vector<8x1xf32>
    %18 = vector.broadcast %17 : vector<8x1xf32> to vector<8x32xf32>
    %19 = arith.subf %0, %18 : vector<8x32xf32>
    %20 = math.exp %19 : vector<8x32xf32>
    %cst_8 = arith.constant dense<0.000000e+00> : vector<8xf32>
    %21 = vector.multi_reduction <add>, %20, %cst_8 [1] : vector<8x32xf32> to vector<8xf32>
    %22 = vector.shape_cast %21 : vector<8xf32> to vector<8x1xf32>
    %23 = math.log %22 : vector<8x1xf32>
    %24 = arith.addf %23, %17 : vector<8x1xf32>
    %25 = arith.subf %24, %15 : vector<8x1xf32>
    %cst_9 = arith.constant 0.000000e+00 : f32
    %26 = vector.broadcast %cst_9 : f32 to vector<8x1xf32>
    %27 = arith.select %8, %1, %26 : vector<8x1xi1>, vector<8x1xf32>
    %28 = vector.shape_cast %27 : vector<8x1xf32> to vector<1x8x1xf32>
    %cst_10 = arith.constant dense<0.000000e+00> : vector<1xf32>
    %29 = vector.multi_reduction <add>, %28, %cst_10 [1, 2] : vector<1x8x1xf32> to vector<1xf32>
    %30 = vector.shape_cast %29 : vector<1xf32> to vector<1x1x1xf32>
    %31 = vector.extract %30[0, 0, 0] : f32 from vector<1x1x1xf32>
    %32 = arith.mulf %25, %1 : vector<8x1xf32>
    %cst_11 = arith.constant 0.000000e+00 : f32
    %33 = vector.broadcast %cst_11 : f32 to vector<8x1xf32>
    %34 = arith.select %8, %32, %33 : vector<8x1xi1>, vector<8x1xf32>
    %35 = vector.shape_cast %34 : vector<8x1xf32> to vector<1x8x1xf32>
    %cst_12 = arith.constant dense<0.000000e+00> : vector<1xf32>
    %36 = vector.multi_reduction <add>, %35, %cst_12 [1, 2] : vector<1x8x1xf32> to vector<1xf32>
    %37 = vector.shape_cast %36 : vector<1xf32> to vector<1x1x1xf32>
    %38 = vector.extract %37[0, 0, 0] : f32 from vector<1x1x1xf32>
    %39 = tpu.iota {dimensions = array<i32: 2>} : vector<1x8x128xi32>
    %40 = tpu.iota {dimensions = array<i32: 1>} : vector<1x8x128xi32>
    %c0_i32 = arith.constant 0 : i32
    %41 = vector.broadcast %c0_i32 : i32 to vector<1x8x128xi32>
    %42 = arith.cmpi eq, %40, %41 : vector<1x8x128xi32>
    %c0_i32_13 = arith.constant 0 : i32
    %43 = vector.broadcast %c0_i32_13 : i32 to vector<1x8x128xi32>
    %44 = arith.cmpi eq, %39, %43 : vector<1x8x128xi32>
    %45 = arith.andi %42, %44 : vector<1x8x128xi1>
    %c0_i32_14 = arith.constant 0 : i32
    %46 = vector.broadcast %c0_i32_14 : i32 to vector<1x8x128xi32>
    %47 = arith.cmpi eq, %40, %46 : vector<1x8x128xi32>
    %c1_i32 = arith.constant 1 : i32
    %48 = vector.broadcast %c1_i32 : i32 to vector<1x8x128xi32>
    %49 = arith.cmpi eq, %39, %48 : vector<1x8x128xi32>
    %50 = arith.andi %47, %49 : vector<1x8x128xi1>
    %cst_15 = arith.constant 0.000000e+00 : f32
    %51 = vector.broadcast %38 : f32 to vector<1x8x128xf32>
    %52 = vector.broadcast %cst_15 : f32 to vector<1x8x128xf32>
    %53 = arith.select %50, %51, %52 : vector<1x8x128xi1>, vector<1x8x128xf32>
    %54 = vector.broadcast %31 : f32 to vector<1x8x128xf32>
    %55 = arith.select %45, %54, %53 : vector<1x8x128xi1>, vector<1x8x128xf32>
    %c0_16 = arith.constant 0 : index
    %c0_17 = arith.constant 0 : index
    %c0_18 = arith.constant 0 : index
    %56 = vector.load %arg4[%c0_16, %c0_17, %c0_18] : memref<1x8x128xf32, #tpu.memory_space<vmem>>, vector<1x8x128xf32>
    tpu.vector_store %arg4[%c0_16, %c0_17, %c0_18], %55 {strides = array<i32>} : memref<1x8x128xf32, #tpu.memory_space<vmem>>, vector<1x8x128xf32>,
    return
  }
  func.func @transform_0(%arg0: i32) -> (i32, i32) {
    %c0_i32 = arith.constant 0 : i32
    %c0_i32_0 = arith.constant 0 : i32
    return %arg0, %c0_i32 : i32, i32
  }
  func.func @transform_1(%arg0: i32) -> (i32, i32) {
    %c0_i32 = arith.constant 0 : i32
    %c0_i32_0 = arith.constant 0 : i32
    return %arg0, %c0_i32 : i32, i32
  }
  func.func @transform_2(%arg0: i32) -> (i32, i32) {
    %c0_i32 = arith.constant 0 : i32
    %c0_i32_0 = arith.constant 0 : i32
    return %arg0, %c0_i32 : i32, i32
  }
  func.func @transform_3(%arg0: i32) -> (i32, i32, i32) {
    %c0_i32 = arith.constant 0 : i32
    %c0_i32_0 = arith.constant 0 : i32
    %c0_i32_1 = arith.constant 0 : i32
    return %arg0, %c0_i32, %c0_i32_0 : i32, i32, i32
  }
}

</mosaic_0001>

<bundles_post_ra>
// kernel: tpu_custom_call.1
= control target key start
LH: loop header
LB: loop body
LE: loop exit
PB: predicated region body
PF: predicated region fallthrough
CT: control target
= control target key end

     0   :  { %vm31_vm0 = vcmask 261120   ;;  %s172_s0 = inlined_call_operand.vmem [shape: f32[8,32], index: 0, kind: input, shape index: {}]   ;;  %s173_s1 = inlined_call_operand.vmem [shape: f32[8,1], index: 1, kind: input, shape index: {}]   ;;  %s174_s2 = inlined_call_operand.vmem [shape: s32[8,1], index: 2, kind: input, shape index: {}]   ;;  %s175_s3 = inlined_call_operand.hbm [shape: f32[1,8,128], index: 3, kind: output, shape index: {}]  }
   0x1   :  { %v15_v0 = vld [vmem:[%s172_s0] sm:$0xff] }
   0x2   :  { %8 = vsyncpa [#allocation3], 0  ;;  %v35_v1 = vsel %vm31_vm0, %v15_v0, -inf  ;;  %v135_v2 = vmov 0   ;;  %v17_v3 = vld [vmem:[%s174_s2] sm:$0xff]  ;;  %v18_v9 = vlaneseq  ;;  %vm49_vm2 = vcmask 7168  }
   0x3   :  { %104 = vset.pattern.permute.xlu0 %v135_v2  ;;  %v16_v14 = vld [vmem:[%s173_s1] sm:$0xff]  ;;  %s136_s1 = smov [#allocation2]   ;;  %s89_s20 = sshll.u32 %s175_s3, 4  ;;  %s90_s20 = int_to_ptr.hbm [resolvable:$true] %s89_s20 }
   0x4   :  { %36 = vmax.xlane.f32.xlu0 %v35_v1  ;;  %v25_v10 = vand.u32 127, %v18_v9  ;;  %v50_v15 = vsel %vm49_vm2, %v16_v14, 0.0  ;;  %v19_v38 = vshrl.u32 %v18_v9, 7  ;;  %s87_s2 = sshll.u32 %s136_s1, 4  ;;  %s88_s2 = int_to_ptr.vmem [resolvable:$true] %s87_s2 }
   0x5   :  { %51 = vadd.xlane.f32.xlu2 %v50_v15 }
   0x6   :  { %vm72_vm3 = vcmp.eq.s32.totalorder %v19_v38, 0  ;;  %vm75_vm4 = vcmp.eq.s32.totalorder %v25_v10, 1  ;;  %vm73_vm5 = vcmp.eq.s32.totalorder %v25_v10, 0 }
   0x7   :  { %vm76_vm6 = vmand %vm72_vm3, %vm75_vm4 }
   0x8   :  { %vm74_vm7 = vmand %vm72_vm3, %vm73_vm5 }
  0x18   :  { %27 = vperm.xlu0 %104, %v17_v3  }
  0x77   :  { %v37_v4 = vpop.xlane.xlu0 %36 }
  0x78   :  { %v38_v5 = vsub.f32 %v15_v0, %v37_v4  ;;  %v52_v24 = vpop.xlane.xlu2 %51 }
  0x79   :  { %v53_v25 = vrot.slane %v52_v24, 4 }
  0x7a   :  { %v39_v6 = vmul.f32 1.442695, %v38_v5 }
  0x7b   :  { %v54_v26 = vadd.f32 %v53_v25, %v52_v24 }
  0x7c   :  { %105 = vpow2.f32 %v39_v6 }
  0x7d   :  { %v55_v27 = vrot.slane %v54_v26, 2 }
  0x7f   :  { %v56_v28 = vadd.f32 %v55_v27, %v54_v26 }
  0x81   :  { %v57_v29 = vrot.slane %v56_v28, 1 }
  0x82   :  { %v106_v7 = vpop.eup %105 }
  0x83   :  { %v41_v8 = vsel %vm31_vm0, %v106_v7, 0.0  ;;  %v58_v30 = vadd.f32 %v57_v29, %v56_v28 }
  0x84   :  { %42 = vadd.xlane.f32.xlu1 %v41_v8 }
  0x85   :  { %98 = vpush %v58_v30 }
  0x8a   :  { %v28_v11 = vpop.permute.xlu0 %27 }
  0x8b   :  { %vm29_vm1 = vcmp.eq.s32.totalorder %v25_v10, %v28_v11 }
  0x8c   :  { %v30_v12 = vsel %vm29_vm1, %v15_v0, 0.0 }
  0x8d   :  { %v32_v13 = vsel %vm31_vm0, %v30_v12, 0.0 }
  0x8e   :  { %33 = vadd.xlane.f32.xlu1 %v32_v13 }
  0xb6   :  { %s99_s17 = spop %98 }
  0xb7   :  { %v79_v40 = vstv %s99_s17 }
  0xf7   :  { %v43_v16 = vpop.xlane.xlu1 %42 }
  0xf8   :  { %107 = vlog2.f32 %v43_v16 }
  0xfe   :  { %v108_v17 = vpop.eup %107 }
  0xff   :  { %v45_v18 = vmul.f32 0.6931472, %v108_v17 }
 0x101   :  { %v46_v19 = vadd.f32 %v45_v18, %v37_v4  ;;  %v34_v20 = vpop.xlane.xlu1 %33 }
 0x103   :  { %v47_v21 = vsub.f32 %v46_v19, %v34_v20 }
 0x105   :  { %v60_v22 = vmul.f32 %v47_v21, %v16_v14 }
 0x107   :  { %v62_v23 = vsel %vm49_vm2, %v60_v22, 0.0 }
 0x108   :  { %63 = vadd.xlane.f32.xlu2 %v62_v23 }
 0x17b   :  { %v64_v31 = vpop.xlane.xlu2 %63 }
 0x17c   :  { %v65_v32 = vrot.slane %v64_v31, 4 }
 0x17e   :  { %v66_v33 = vadd.f32 %v65_v32, %v64_v31 }
 0x180   :  { %v67_v34 = vrot.slane %v66_v33, 2 }
 0x182   :  { %v68_v35 = vadd.f32 %v67_v34, %v66_v33 }
 0x184   :  { %v69_v36 = vrot.slane %v68_v35, 1 }
 0x186   :  { %v70_v37 = vadd.f32 %v69_v36, %v68_v35 }
 0x188   :  { %100 = vpush %v70_v37 }
 0x1b9   :  { %s101_s21 = spop %100 }
 0x1ba   :  { %v77_v39 = vstv %s101_s21 }
 0x1bb   :  { %v78_v41 = vsel %vm76_vm6, %v77_v39, 0.0 }
 0x1bc   :  { %v80_v42 = vsel %vm74_vm7, %v79_v40, %v78_v41 }
 0x1bd   :  { %81 = vst [vmem:[#allocation2] sm:$0xff] %v80_v42 }
 0x1be   :  { %92 = dma.vmem_to_hbm [thread:$0]  %s88_s2, 128, %s90_s20, [#allocation3]  }
 0x1bf   :  { %133 = dma.done.wait [#allocation3], 128  }
 0x1c0   :  { %134 = vsyncadd [#allocation3], 4294967168 }
 0x1c1   :  { %97 = vsyncpa [#allocation3], 1 }

</bundles_post_ra>
